<compile_context>
chip_gen: v5e
topology: v5e:2x2
jax: 0.10.0
libtpu: 0.0.40
codegen_flags: <defaults>
</compile_context>

<pallas_src>
import functools

import jax
import jax.numpy as jnp
from jax.experimental import pallas as pl
from jax.experimental.pallas import tpu as pltpu

RRELU_LOWER = 1.0 / 8.0
RRELU_UPPER = 1.0 / 3.0
RRELU_SLOPE = 0.5 * (RRELU_LOWER + RRELU_UPPER)  # eval-mode fixed slope

LANE = 128      # TPU lane width (last dim)
SUBLANE = 8     # f32 sublane width (second-to-last dim)


def _round_up(x, m):
    return ((x + m - 1) // m) * m


def mlp_kernel(x_ref, w1_ref, w2_ref, w3_ref, b_ref, o_ref, *, num_outputs, matmul_dtype):
    """Fused 3-layer MLP on one (tile_b, num_inputs) batch tile.

    Hidden activations are 128 lanes wide (zero-padded), the final store is (tile_b, num_outputs).
    """
    x = x_ref[...].astype(matmul_dtype)

    # Layer 1: Linear + RReLU (eval mode: fixed negative slope). f32 accumulation on the MXU.
    h1 = jnp.dot(x, w1_ref[...].astype(matmul_dtype), preferred_element_type=jnp.float32)
    h1 = h1 + b_ref[0:1, :]
    h1 = jnp.where(h1 >= 0.0, h1, h1 * RRELU_SLOPE)

    # Layer 2: Linear + ReLU.
    h2 = jnp.dot(h1.astype(matmul_dtype), w2_ref[...].astype(matmul_dtype),
                 preferred_element_type=jnp.float32)
    h2 = jnp.maximum(h2 + b_ref[1:2, :], 0.0)

    # Layer 3: Linear -> narrow (tile_b, num_outputs) store (only useful bytes go back to HBM).
    out = jnp.dot(h2.astype(matmul_dtype), w3_ref[...].astype(matmul_dtype),
                  preferred_element_type=jnp.float32)
    b3 = b_ref[2:3, :][:, :num_outputs]
    o_ref[...] = (out + b3).astype(o_ref.dtype)


def init_params(key, num_inputs, num_outputs):
    """Deterministic init mimicking PyTorch Linear default (uniform +/- 1/sqrt(fan_in)).

    Weights are stored as (in_features, out_features) = PyTorch W.T; biases as (1, out_features).
    """
    dims = [(num_inputs, 30), (30, 20), (20, num_outputs)]
    params = []
    for fan_in, fan_out in dims:
        key, kw, kb = jax.random.split(key, 3)
        bound = 1.0 / jnp.sqrt(float(fan_in))
        w = jax.random.uniform(kw, (fan_in, fan_out), jnp.float32, -bound, bound)
        b = jax.random.uniform(kb, (1, fan_out), jnp.float32, -bound, bound)
        params.extend([w, b])
    return tuple(params)


def pack_params(params):
    """Pack weights for the kernel.

      w1 -> (num_inputs, 128)    : only the hidden dim is padded; K stays at num_inputs.
      w2 -> (128, 128)
      w3 -> (128, num_outputs)   : output stays narrow so the writeback is narrow.
      b  -> (8, 128) tile, rows 0/1/2 = b1/b2/b3 (b3 occupies the first num_outputs lanes).

    Zero-padded rows/columns are exactly zero, so they are inert through matmul, bias add,
    RReLU and ReLU.
    """
    w1, b1, w2, b2, w3, b3 = params
    num_inputs = w1.shape[0]
    num_outputs = w3.shape[1]

    w1p = jnp.zeros((num_inputs, LANE), jnp.float32).at[:, :w1.shape[1]].set(w1)
    w2p = jnp.zeros((LANE, LANE), jnp.float32).at[:w2.shape[0], :w2.shape[1]].set(w2)
    w3p = jnp.zeros((LANE, num_outputs), jnp.float32).at[:w3.shape[0], :].set(w3)

    bias = jnp.zeros((SUBLANE, LANE), jnp.float32)
    bias = bias.at[0, :b1.shape[1]].set(b1[0])
    bias = bias.at[1, :b2.shape[1]].set(b2[0])
    bias = bias.at[2, :b3.shape[1]].set(b3[0])

    return (w1p, w2p, w3p, bias), num_inputs, num_outputs


def neural_network_forward(x, packed, num_inputs, num_outputs,
                           *, tile_b=None, use_bf16_matmul=None):
    """Fused 3-layer MLP forward.

    Batch is tiled over a 1-D "parallel" grid (ragged boundary block handled by Pallas);
    the tiny weights / packed bias stay VMEM-resident via constant index_maps.
    """
    w1p, w2p, w3p, bias = packed
    batch = x.shape[0]

    if use_bf16_matmul is None:
        # bf16-at-the-dot only helps on v5e (bf16-native MXU, f32 dots are multi-pass);
        # on v6e/v7x the kernel is HBM-bound and f32 compute is negligible.
        kind = jax.devices()[0].device_kind.lower()
        use_bf16_matmul = ("v5e" in kind) or ("v5 lite" in kind) or ("v5lite" in kind)

    if tile_b is None:
        # Large tiles amortize the ~0.35 us per-grid-step overhead; aim for >= 2 grid steps so
        # both v7x TensorCores get work (harmless on single-TC v5e/v6e). Cap at 2048 rows.
        half = pl.cdiv(batch, 2)
        tile_b = min(2048, max(SUBLANE, _round_up(half, SUBLANE)))
    tile_b = max(SUBLANE, _round_up(int(tile_b), SUBLANE))
    grid = pl.cdiv(batch, tile_b)   # ragged boundary block: inputs clipped, output store clipped

    kernel = functools.partial(
        mlp_kernel,
        num_outputs=num_outputs,
        matmul_dtype=jnp.bfloat16 if use_bf16_matmul else jnp.float32,
    )

    out = pl.pallas_call(
        kernel,
        out_shape=jax.ShapeDtypeStruct((batch, num_outputs), jnp.float32),
        grid_spec=pltpu.PrefetchScalarGridSpec(
            num_scalar_prefetch=0,
            grid=(grid,),
            in_specs=[
                pl.BlockSpec((tile_b, num_inputs), lambda i: (i, 0)),    # x: tiled over batch, K=num_inputs
                pl.BlockSpec((num_inputs, LANE), lambda i: (0, 0)),      # w1: resident
                pl.BlockSpec((LANE, LANE), lambda i: (0, 0)),            # w2: resident
                pl.BlockSpec((LANE, num_outputs), lambda i: (0, 0)),     # w3: resident, narrow N
                pl.BlockSpec((SUBLANE, LANE), lambda i: (0, 0)),         # packed biases: resident
            ],
            out_specs=pl.BlockSpec((tile_b, num_outputs), lambda i: (i, 0)),
        ),
        compiler_params=pltpu.CompilerParams(
            dimension_semantics=("parallel",),   # shard batch tiles across TCs on v7x
            vmem_limit_bytes=32 * 1024 * 1024,   # generous guard; actual footprint << 1 MiB
        ),
    )(x, w1p, w2p, w3p, bias)

    return out


def reference_forward(x, params):
    """Pure-JAX reference with identical (f32, eval-mode RReLU) semantics."""
    w1, b1, w2, b2, w3, b3 = params
    h1 = x @ w1 + b1
    h1 = jnp.where(h1 >= 0.0, h1, h1 * RRELU_SLOPE)
    h2 = jnp.maximum(h1 @ w2 + b2, 0.0)
    return h2 @ w3 + b3


if __name__ == "__main__":
    num_inputs, num_outputs = 32, 10
    batch = 8

    key = jax.random.PRNGKey(0)
    key, kx = jax.random.split(key)
    x = jax.random.normal(kx, (batch, num_inputs), jnp.float32)
    params = init_params(key, num_inputs, num_outputs)
    packed, n_in, n_out = pack_params(params)

    # f32 MXU path: must match the reference tightly (same semantics as the PyTorch module).
    logits = neural_network_forward(x, packed, n_in, n_out, use_bf16_matmul=False)
    logits = jax.block_until_ready(logits)
    ref = reference_forward(x, params)
    assert logits.shape == (batch, num_outputs)
    assert jnp.allclose(logits, ref, atol=1e-5, rtol=1e-5)

    # bf16-at-the-dot path (f32 accumulate / f32 elementwise): looser tolerance.
    logits_bf16 = neural_network_forward(x, packed, n_in, n_out, use_bf16_matmul=True)
    logits_bf16 = jax.block_until_ready(logits_bf16)
    assert jnp.allclose(logits_bf16, ref, atol=3e-2, rtol=3e-2)

    # Larger, non-tile-multiple batch exercises the multi-step grid + ragged boundary block.
    batch_l = 1037
    key, kxl = jax.random.split(key)
    x_l = jax.random.normal(kxl, (batch_l, num_inputs), jnp.float32)
    logits_l = neural_network_forward(x_l, packed, n_in, n_out, tile_b=512, use_bf16_matmul=False)
    logits_l = jax.block_until_ready(logits_l)
    ref_l = reference_forward(x_l, params)
    assert logits_l.shape == (batch_l, num_outputs)
    assert jnp.allclose(logits_l, ref_l, atol=1e-5, rtol=1e-5)

    # Default tile selection path (auto tile_b, auto matmul dtype for the local chip).
    logits_auto = neural_network_forward(x_l, packed, n_in, n_out)
    logits_auto = jax.block_until_ready(logits_auto)
    assert logits_auto.shape == (batch_l, num_outputs)
    assert jnp.allclose(logits_auto, ref_l, atol=3e-2, rtol=3e-2)

    print("KERNEL_OK")
</pallas_src>

<mosaic_0001>
module attributes {stable_mosaic.version = 11 : i64} {
  func.func @mlp_kernel(%arg0: i32, %arg1: memref<8x32xf32, #tpu.memory_space<vmem>>, %arg2: memref<32x128xf32, #tpu.memory_space<vmem>>, %arg3: memref<128x128xf32, #tpu.memory_space<vmem>>, %arg4: memref<128x10xf32, #tpu.memory_space<vmem>>, %arg5: memref<8x128xf32, #tpu.memory_space<vmem>>, %arg6: memref<8x10xf32, #tpu.memory_space<vmem>>) attributes {dimension_semantics = [#tpu.dimension_semantics<parallel>], iteration_bounds = array<i64: 1>, scalar_prefetch = 0 : i64, scratch_operands = 0 : i64, tpu.core_type = #tpu.core_type<tc>, window_params = [{transform_indices = @transform_0, window_bounds = array<i64: 8, 32>}, {pipeline_mode = #tpu.pipeline_mode<synchronous>, transform_indices = @transform_1, window_bounds = array<i64: 32, 128>}, {pipeline_mode = #tpu.pipeline_mode<synchronous>, transform_indices = @transform_2, window_bounds = array<i64: 128, 128>}, {pipeline_mode = #tpu.pipeline_mode<synchronous>, transform_indices = @transform_3, window_bounds = array<i64: 128, 10>}, {pipeline_mode = #tpu.pipeline_mode<synchronous>, transform_indices = @transform_4, window_bounds = array<i64: 8, 128>}, {transform_indices = @transform_5, window_bounds = array<i64: 8, 10>}]} {
    %c0 = arith.constant 0 : index
    %c0_0 = arith.constant 0 : index
    %0 = vector.load %arg1[%c0, %c0_0] : memref<8x32xf32, #tpu.memory_space<vmem>>, vector<8x32xf32>
    %c0_1 = arith.constant 0 : index
    %c0_2 = arith.constant 0 : index
    %1 = vector.load %arg2[%c0_1, %c0_2] : memref<32x128xf32, #tpu.memory_space<vmem>>, vector<32x128xf32>
    %cst = arith.constant dense<0.000000e+00> : vector<8x128xf32>
    %2 = tpu.matmul %0, %1, %cst {dimension_numbers = #tpu.dot_dimension_numbers<[1], [0], [0], [1], [0, 0, 1, 1], [], []>} : vector<8x32xf32>, vector<32x128xf32>, vector<8x128xf32> -> vector<8x128xf32>
    %c0_3 = arith.constant 0 : index
    %c0_4 = arith.constant 0 : index
    %3 = vector.load %arg5[%c0_3, %c0_4] : memref<8x128xf32, #tpu.memory_space<vmem>>, vector<1x128xf32>
    %4 = vector.broadcast %3 : vector<1x128xf32> to vector<8x128xf32>
    %5 = arith.addf %2, %4 : vector<8x128xf32>
    %cst_5 = arith.constant 0.000000e+00 : f32
    %6 = vector.broadcast %cst_5 : f32 to vector<8x128xf32>
    %7 = arith.cmpf oge, %5, %6 : vector<8x128xf32>
    %cst_6 = arith.constant 0.229166672 : f32
    %8 = vector.broadcast %cst_6 : f32 to vector<8x128xf32>
    %9 = arith.mulf %5, %8 : vector<8x128xf32>
    %10 = arith.select %7, %5, %9 : vector<8x128xi1>, vector<8x128xf32>
    %c0_7 = arith.constant 0 : index
    %c0_8 = arith.constant 0 : index
    %11 = vector.load %arg3[%c0_7, %c0_8] : memref<128x128xf32, #tpu.memory_space<vmem>>, vector<128x128xf32>
    %cst_9 = arith.constant dense<0.000000e+00> : vector<8x128xf32>
    %12 = tpu.matmul %10, %11, %cst_9 {dimension_numbers = #tpu.dot_dimension_numbers<[1], [0], [0], [1], [0, 0, 1, 1], [], []>} : vector<8x128xf32>, vector<128x128xf32>, vector<8x128xf32> -> vector<8x128xf32>
    %c1 = arith.constant 1 : index
    %c0_10 = arith.constant 0 : index
    %13 = vector.load %arg5[%c1, %c0_10] : memref<8x128xf32, #tpu.memory_space<vmem>>, vector<1x128xf32>
    %14 = vector.broadcast %13 : vector<1x128xf32> to vector<8x128xf32>
    %15 = arith.addf %12, %14 : vector<8x128xf32>
    %cst_11 = arith.constant 0.000000e+00 : f32
    %16 = vector.broadcast %cst_11 : f32 to vector<8x128xf32>
    %17 = arith.maximumf %15, %16 : vector<8x128xf32>
    %c0_12 = arith.constant 0 : index
    %c0_13 = arith.constant 0 : index
    %18 = vector.load %arg4[%c0_12, %c0_13] : memref<128x10xf32, #tpu.memory_space<vmem>>, vector<128x10xf32>
    %cst_14 = arith.constant dense<0.000000e+00> : vector<8x10xf32>
    %19 = tpu.matmul %17, %18, %cst_14 {dimension_numbers = #tpu.dot_dimension_numbers<[1], [0], [0], [1], [0, 0, 1, 1], [], []>} : vector<8x128xf32>, vector<128x10xf32>, vector<8x10xf32> -> vector<8x10xf32>
    %c2 = arith.constant 2 : index
    %c0_15 = arith.constant 0 : index
    %20 = vector.load %arg5[%c2, %c0_15] : memref<8x128xf32, #tpu.memory_space<vmem>>, vector<1x128xf32>
    %21 = vector.extract_strided_slice %20 {offsets = [0, 0], sizes = [1, 10], strides = [1, 1]} : vector<1x128xf32> to vector<1x10xf32>
    %22 = vector.broadcast %21 : vector<1x10xf32> to vector<8x10xf32>
    %23 = arith.addf %19, %22 : vector<8x10xf32>
    %c0_16 = arith.constant 0 : index
    %c0_17 = arith.constant 0 : index
    %24 = vector.load %arg6[%c0_16, %c0_17] : memref<8x10xf32, #tpu.memory_space<vmem>>, vector<8x10xf32>
    tpu.vector_store %arg6[%c0_16, %c0_17], %23 {strides = array<i32>} : memref<8x10xf32, #tpu.memory_space<vmem>>, vector<8x10xf32>,
    return
  }
  func.func @transform_0(%arg0: i32) -> (i32, i32) {
    %c0_i32 = arith.constant 0 : i32
    %c0_i32_0 = arith.constant 0 : i32
    return %arg0, %c0_i32 : i32, i32
  }
  func.func @transform_1(%arg0: i32) -> (i32, i32) {
    %c0_i32 = arith.constant 0 : i32
    %c0_i32_0 = arith.constant 0 : i32
    %c0_i32_1 = arith.constant 0 : i32
    return %c0_i32, %c0_i32_0 : i32, i32
  }
  func.func @transform_2(%arg0: i32) -> (i32, i32) {
    %c0_i32 = arith.constant 0 : i32
    %c0_i32_0 = arith.constant 0 : i32
    %c0_i32_1 = arith.constant 0 : i32
    return %c0_i32, %c0_i32_0 : i32, i32
  }
  func.func @transform_3(%arg0: i32) -> (i32, i32) {
    %c0_i32 = arith.constant 0 : i32
    %c0_i32_0 = arith.constant 0 : i32
    %c0_i32_1 = arith.constant 0 : i32
    return %c0_i32, %c0_i32_0 : i32, i32
  }
  func.func @transform_4(%arg0: i32) -> (i32, i32) {
    %c0_i32 = arith.constant 0 : i32
    %c0_i32_0 = arith.constant 0 : i32
    %c0_i32_1 = arith.constant 0 : i32
    return %c0_i32, %c0_i32_0 : i32, i32
  }
  func.func @transform_5(%arg0: i32) -> (i32, i32) {
    %c0_i32 = arith.constant 0 : i32
    %c0_i32_0 = arith.constant 0 : i32
    return %arg0, %c0_i32 : i32, i32
  }
}

</mosaic_0001>

<bundles_post_ra>
// kernel: tpu_custom_call.1
= control target key start
LH: loop header
LB: loop body
LE: loop exit
PB: predicated region body
PF: predicated region fallthrough
CT: control target
= control target key end

     0   :  { %10 = vsyncpa [#allocation3], 0  ;;  %s375_s0 = inlined_call_operand.vmem [shape: f32[8,32], index: 0, kind: input, shape index: {}]   ;;  %s376_s1 = inlined_call_operand.hbm [shape: f32[32,128], index: 1, kind: input, shape index: {}]   ;;  %s377_s2 = inlined_call_operand.vmem [shape: f32[128,128], index: 2, kind: input, shape index: {}]   ;;  %s378_s3 = inlined_call_operand.vmem [shape: f32[128,10], index: 3, kind: input, shape index: {}]   ;;  %s379_s4 = inlined_call_operand.vmem [shape: f32[8,128], index: 4, kind: input, shape index: {}]   ;;  %s380_s5 = inlined_call_operand.hbm [shape: f32[8,10], index: 5, kind: output, shape index: {}]  }
   0x1   :  { %11 = vsyncpa [#allocation4], 0  ;;  %s18_s20 = sshll.u32 %s376_s1, 4  ;;  %s227_s21 = smov [#allocation2]   ;;  %s19_s20 = int_to_ptr.hbm [resolvable:$true] %s18_s20 }
   0x2   :  { %s20_s22 = sshll.u32 %s227_s21, 4  ;;  %s228_s23 = smov 128   ;;  %s21_s22 = int_to_ptr.vmem [resolvable:$true] %s20_s22 }
   0x3   :  { %s229_s24 = smov 8  }
   0x4   :  { %26 = dma.hbm_to_vmem [thread:$0]  %s19_s20, 512, %s21_s22, [#allocation3], %s228_s23, %s228_s23, %s229_s24  }
   0x5   :  { %223 = dma.done.wait [#allocation3], 512  }
   0x6   :  { %224 = vsyncadd [#allocation3], 4294966784  ;;  %v41_v0 = vld [vmem:[#allocation2 + $0x18] sm:$0xff]  ;;  %v40_v1 = vld [vmem:[#allocation2 + $0x10] sm:$0xff]  ;;  %vm44_vm0 = vcmask 261120   ;;  %s230_s14 = smov [#allocation5]  }
   0x7   :  { %60 = vmatpush.msra.mxu0 %v41_v0  ;;  %v86_v2 = vld [vmem:[%s377_s2 + $0x78] sm:$0xff]  ;;  %v39_v3 = vld [vmem:[#allocation2 + $0x8] sm:$0xff]  ;;  %v85_v4 = vld [vmem:[%s377_s2 + $0x70] sm:$0xff]  ;;  %s155_s15 = sshll.u32 %s230_s14, 4  ;;  %s157_s18 = sshll.u32 %s380_s5, 4  ;;  %vm148_vm2 = vcmask 80896   ;;  %s156_s15 = int_to_ptr.vmem [resolvable:$true] %s155_s15  ;;  %s158_s18 = int_to_ptr.hbm [resolvable:$true] %s157_s18 }
   0x8   :  { %89 = vmatpush.msra.mxu1 %v86_v2  ;;  %v84_v5 = vld [vmem:[%s377_s2 + $0x68] sm:$0xff]  ;;  %v38_v6 = vld [vmem:[#allocation2] sm:$0xff]  ;;  %v82_v9 = vld [vmem:[%s377_s2 + $0x58] sm:$0xff] }
   0x9   :  { %61 = vmatpush.msra.mxu0 %v40_v1  ;;  %v37_v7 = vld [vmem:[%s375_s0] sm:$0xff]  ;;  %v81_v10 = vld [vmem:[%s377_s2 + $0x50] sm:$0xff]  ;;  %v80_v11 = vld [vmem:[%s377_s2 + $0x48] sm:$0xff] }
   0xa   :  { %90 = vmatpush.msra.mxu1 %v85_v4  ;;  %v83_v8 = vld [vmem:[%s377_s2 + $0x60] sm:$0xff]  ;;  %v78_v13 = vld [vmem:[%s377_s2 + $0x38] sm:$0xff]  ;;  %v77_v14 = vld [vmem:[%s377_s2 + $0x30] sm:$0xff] }
   0xb   :  { %62 = vmatpush.msra.mxu0 %v39_v3  ;;  %v79_v12 = vld [vmem:[%s377_s2 + $0x40] sm:$0xff]  ;;  %v76_v15 = vld [vmem:[%s377_s2 + $0x28] sm:$0xff]  ;;  %v74_v17 = vld [vmem:[%s377_s2 + $0x18] sm:$0xff] }
   0xc   :  { %91 = vmatpush.msra.mxu1 %v84_v5  ;;  %v75_v16 = vld [vmem:[%s377_s2 + $0x20] sm:$0xff]  ;;  %v73_v18 = vld [vmem:[%s377_s2 + $0x10] sm:$0xff]  ;;  %v72_v19 = vld [vmem:[%s377_s2 + $0x8] sm:$0xff] }
   0xd   :  { %63 = vmatpush.msra.mxu0 %v38_v6  ;;  %v71_v20 = vld [vmem:[%s377_s2] sm:$0xff]  ;;  %v125_v21 = vld [vmem:[%s378_s3 + $0x78] sm:$0xff]  ;;  %v124_v22 = vld [vmem:[%s378_s3 + $0x70] sm:$0xff] }
   0xe   :  { %167 = vmatmul.msk.f32.vlgmr.msra.gmra.mxu0 %vm44_vm0, %v37_v7  ;;  %92 = vmatpush.msra.mxu1 %v83_v8  ;;  %v123_v23 = vld [vmem:[%s378_s3 + $0x68] sm:$0xff]  ;;  %v122_v24 = vld [vmem:[%s378_s3 + $0x60] sm:$0xff]  ;;  %v121_v25 = vld [vmem:[%s378_s3 + $0x58] sm:$0xff] }
   0xf   :  { %128 = vmatpush.msra.mxu2 %v125_v21  ;;  %v120_v26 = vld [vmem:[%s378_s3 + $0x50] sm:$0xff]  ;;  %v119_v27 = vld [vmem:[%s378_s3 + $0x48] sm:$0xff]  ;;  %v118_v28 = vld [vmem:[%s378_s3 + $0x40] sm:$0xff] }
  0x10   :  { %93 = vmatpush.msra.mxu1 %v82_v9  ;;  %v117_v29 = vld [vmem:[%s378_s3 + $0x38] sm:$0xff]  ;;  %v116_v30 = vld [vmem:[%s378_s3 + $0x30] sm:$0xff]  ;;  %v115_v31 = vld [vmem:[%s378_s3 + $0x28] sm:$0xff] }
  0x11   :  { %129 = vmatpush.msra.mxu2 %v124_v22  ;;  %v114_v32 = vld [vmem:[%s378_s3 + $0x20] sm:$0xff]  ;;  %v113_v33 = vld [vmem:[%s378_s3 + $0x18] sm:$0xff]  ;;  %v112_v39 = vld [vmem:[%s378_s3 + $0x10] sm:$0xff] }
  0x12   :  { %94 = vmatpush.msra.mxu1 %v81_v10  ;;  %v172_v34 = vld [vmem:[%s379_s4] ss:$0 sm:$0xff]  ;;  %v111_v40 = vld [vmem:[%s378_s3 + $0x8] sm:$0xff]  ;;  %v173_v42 = vld [vmem:[%s379_s4 + $0x1] ss:$0 sm:$0xff] }
  0x13   :  { %130 = vmatpush.msra.mxu2 %v123_v23  ;;  %v110_v41 = vld [vmem:[%s378_s3] sm:$0xff] }
  0x14   :  { %95 = vmatpush.msra.mxu1 %v80_v11  ;;  %v174_v46 = vld [vmem:[%s379_s4 + $0x2] ss:$0 sm:$0xff] }
  0x15   :  { %131 = vmatpush.msra.mxu2 %v122_v24 }
  0x16   :  { %96 = vmatpush.msra.mxu1 %v79_v12 }
  0x17   :  { %132 = vmatpush.msra.mxu2 %v121_v25 }
  0x18   :  { %97 = vmatpush.msra.mxu1 %v78_v13 }
  0x19   :  { %133 = vmatpush.msra.mxu2 %v120_v26 }
  0x1a   :  { %98 = vmatpush.msra.mxu1 %v77_v14 }
  0x1b   :  { %134 = vmatpush.msra.mxu2 %v119_v27 }
  0x1c   :  { %99 = vmatpush.msra.mxu1 %v76_v15 }
  0x1d   :  { %135 = vmatpush.msra.mxu2 %v118_v28 }
  0x1e   :  { %100 = vmatpush.msra.mxu1 %v75_v16 }
  0x1f   :  { %136 = vmatpush.msra.mxu2 %v117_v29 }
  0x20   :  { %101 = vmatpush.msra.mxu1 %v74_v17 }
  0x21   :  { %137 = vmatpush.msra.mxu2 %v116_v30 }
  0x22   :  { %102 = vmatpush.msra.mxu1 %v73_v18 }
  0x23   :  { %138 = vmatpush.msra.mxu2 %v115_v31 }
  0x24   :  { %103 = vmatpush.msra.mxu1 %v72_v19 }
  0x25   :  { %139 = vmatpush.msra.mxu2 %v114_v32 }
  0x26   :  { %104 = vmatpush.msra.mxu1 %v71_v20 }
  0x27   :  { %140 = vmatpush.msra.mxu2 %v113_v33 }
  0x29   :  { %141 = vmatpush.msra.mxu2 %v112_v39 }
  0x2b   :  { %142 = vmatpush.msra.mxu2 %v111_v40 }
  0x2d   :  { %143 = vmatpush.msra.mxu2 %v110_v41 }
  0x8b   :  { %v65_v35 = vpop.f32.mrf.mxu0 }
  0x8c   :  { %v66_v36 = vadd.f32 %v172_v34, %v65_v35 }
  0x8e   :  { %vm68_vm1 = vcmp.ge.f32.partialorder %v66_v36, 0.0  ;;  %v69_v37 = vmul.f32 0.22916667, %v66_v36 }
  0x90   :  { %v70_v38 = vsel %vm68_vm1, %v66_v36, %v69_v37 }
  0x91   :  { %105 = vmatmul.f32.vlgmr.msra.gmra.mxu1 %v70_v38 }
 0x10e   :  { %v106_v43 = vpop.f32.mrf.mxu1 }
 0x10f   :  { %v107_v44 = vadd.f32 %v173_v42, %v106_v43 }
 0x111   :  { %v109_v45 = vmax.f32 %v107_v44, 0.0 }
 0x113   :  { %144 = vmatmul.f32.vlgmr.msra.gmra.mxu2 %v109_v45 }
 0x196   :  { %v145_v47 = vpop.f32.mrf.mxu2 }
 0x197   :  { %v146_v48 = vadd.f32 %v174_v46, %v145_v47 }
 0x199   :  { %149 = vst.msk [vmem:[#allocation5] sm:$0xff] %vm148_vm2, %v146_v48 }
 0x19a   :  { %160 = dma.vmem_to_hbm [thread:$0]  %s156_s15, 128, %s158_s18, [#allocation4]  }
 0x19b   :  { %225 = dma.done.wait [#allocation4], 128  }
 0x19c   :  { %226 = vsyncadd [#allocation4], 4294967168 }
 0x19d   :  { %165 = vsyncpa [#allocation3], 1 }
 0x19e   :  { %166 = vsyncpa [#allocation4], 1 }

</bundles_post_ra>
